<compile_context>
chip_gen: v7x
topology: tpu7x:2x2x1
jax: 0.10.0
libtpu: 0.0.40
codegen_flags: <defaults>
</compile_context>

<pallas_src>
import jax
import jax.numpy as jnp
from jax import lax
from jax.experimental import pallas as pl
from jax.experimental.pallas import tpu as pltpu

BN_EPS = 1e-3


def _round_up(x, m):
    return (x + m - 1) // m * m


def _vmem_budget_bytes():
    """Scoped-VMEM request derived from the chip's physical VMEM."""
    cap = 64 * 1024 * 1024                      # conservative fallback (v7x-sized)
    try:
        cap = int(pltpu.get_tpu_info().vmem_capacity_bytes)
    except Exception:
        pass
    # ~25% headroom for Mosaic-internal scratch; cap at 100 MiB.
    return min(cap * 3 // 4, 100 * 1024 * 1024)


def _choose_tiles(m_rows, k_dim, cout_pad, in_bytes, y_bytes, out_bytes,
                  budget, tile_m):
    """Generation/shape-aware tile sizes for pass 1 (matmul) and pass 2 (BN+ReLU)."""
    m_ceil = _round_up(m_rows, 8)
    headroom = 2 * 1024 * 1024
    if tile_m is None:
        # Pass-1 VMEM: 2x double-buffered patches tile + 1x weight + 2x y tile.
        fixed = k_dim * cout_pad * in_bytes                 # single-buffered weight
        per_row = 2 * k_dim * in_bytes + 2 * cout_pad * y_bytes
        avail = max(budget - fixed - headroom, per_row * 8)
        tile_m = min(1024, m_ceil, avail // per_row)
    tile_m = max(8, (min(int(tile_m), m_ceil) // 8) * 8)
    m_pad = _round_up(m_rows, tile_m)
    num_tiles = m_pad // tile_m

    # Pass 2 is pure HBM streaming: use the largest tile that divides m_pad.
    per_row2 = 2 * cout_pad * (y_bytes + out_bytes)
    cap2 = max(tile_m, min(4096, (budget - headroom) // per_row2))
    factor = 1
    for f in range(min(num_tiles, cap2 // tile_m), 0, -1):
        if num_tiles % f == 0:
            factor = f
            break
    tile_m2 = tile_m * factor
    return tile_m, m_pad, num_tiles, tile_m2


# ---------------------------------------------------------------------------
# Pass 1: conv-as-matmul + per-tile channel sum / sum-of-squares partials.
# ---------------------------------------------------------------------------
def _conv_stats_kernel(p_ref, w_ref, y_ref, sum_ref, sumsq_ref):
    # MXU matmul in the operands' native dtype (bf16-friendly); f32 accumulate.
    y = jnp.dot(p_ref[...], w_ref[...], preferred_element_type=jnp.float32)
    y_ref[...] = y.astype(y_ref.dtype)               # (tile_m, Cout_pad) intermediate
    # Per-tile partial BN stats taken from the f32 result (pre-downcast).
    sum_ref[...] = jnp.broadcast_to(jnp.sum(y, axis=0), sum_ref.shape)
    sumsq_ref[...] = jnp.broadcast_to(jnp.sum(y * y, axis=0), sumsq_ref.shape)


# ---------------------------------------------------------------------------
# Pass 2: fused normalize (precomputed scale/shift) + ReLU.
# ---------------------------------------------------------------------------
def _bn_relu_kernel(y_ref, scale_ref, shift_ref, o_ref):
    y = y_ref[...].astype(jnp.float32)
    o_ref[...] = jnp.maximum(y * scale_ref[...] + shift_ref[...],
                             0.0).astype(o_ref.dtype)


def _im2col_nhwc(x, kh, kw, stride, pad):
    """x: (N, H, W, C) -> patches (N*Ho*Wo, kh*kw*C). Pure indexing, no conv."""
    n, h, w, c = x.shape
    xp = jnp.pad(x, ((0, 0), (pad, pad), (pad, pad), (0, 0)))
    ho = (h + 2 * pad - kh) // stride + 1
    wo = (w + 2 * pad - kw) // stride + 1
    cols = []
    for i in range(kh):
        for j in range(kw):
            cols.append(xp[:, i:i + stride * ho:stride, j:j + stride * wo:stride, :])
    patches = jnp.stack(cols, axis=3)                 # (N, Ho, Wo, kh*kw, C)
    return patches.reshape(n * ho * wo, kh * kw * c), ho, wo


def basic_conv2d(x_nchw, conv_weight, bn_gamma, bn_beta, *, stride, padding,
                 compute_dtype=jnp.bfloat16, tile_m=None):
    """Forward of BasicConv2d.

    x_nchw: (N, Cin, H, W); conv_weight: (Cout, Cin, kh, kw).
    compute_dtype: dtype of the MXU operands and of the conv intermediate
      (MXU accumulation and BN statistics stay in f32).  Use jnp.float32 for
      an exact-precision path.
    """
    n, cin, h, w = x_nchw.shape
    cout, _, kh, kw = conv_weight.shape
    out_dtype = x_nchw.dtype
    compute_dtype = jnp.dtype(compute_dtype)

    # TODO(synk): keep activations NHWC across the network to drop this pair
    # of per-layer transposes.
    x_nhwc = jnp.transpose(x_nchw, (0, 2, 3, 1)).astype(compute_dtype)
    # TODO(synk): implicit in-kernel im2col to remove the kh*kw HBM read
    # amplification of this explicit patches matrix.
    patches, ho, wo = _im2col_nhwc(x_nhwc, kh, kw, stride, padding)    # (M, K)
    m_rows, k_dim = patches.shape

    cout_pad = _round_up(cout, 128)                    # lane-dense output
    in_bytes = compute_dtype.itemsize
    y_dtype = compute_dtype                            # bf16 intermediate by default
    y_bytes = jnp.dtype(y_dtype).itemsize
    out_bytes = jnp.dtype(out_dtype).itemsize
    budget = _vmem_budget_bytes()

    tile_m, m_pad, num_tiles, tile_m2 = _choose_tiles(
        m_rows, k_dim, cout_pad, in_bytes, y_bytes, out_bytes, budget, tile_m)

    if m_pad != m_rows:
        # Zero rows contribute 0 to sum/sumsq; stats divide by the true M.
        patches = jnp.pad(patches, ((0, m_pad - m_rows), (0, 0)))

    # Weight -> (kh, kw, Cin, Cout) -> (K, Cout_pad), zero-padded channels.
    w_mat = jnp.transpose(conv_weight, (2, 3, 1, 0)).reshape(k_dim, cout)
    w_mat = jnp.pad(w_mat, ((0, 0), (0, cout_pad - cout))).astype(compute_dtype)

    gamma_p = jnp.pad(bn_gamma.astype(jnp.float32), (0, cout_pad - cout),
                      constant_values=1.0)
    beta_p = jnp.pad(bn_beta.astype(jnp.float32), (0, cout_pad - cout))

    # --- pass 1: conv matmul + per-tile channel stats ("parallel" over M) ---
    p1_bytes = (patches.size * in_bytes + w_mat.size * in_bytes
                + m_pad * cout_pad * y_bytes + 2 * num_tiles * 8 * cout_pad * 4)
    y, part_sum, part_sumsq = pl.pallas_call(
        _conv_stats_kernel,
        out_shape=(
            jax.ShapeDtypeStruct((m_pad, cout_pad), y_dtype),            # conv y
            jax.ShapeDtypeStruct((num_tiles, 8, cout_pad), jnp.float32),  # sum
            jax.ShapeDtypeStruct((num_tiles, 8, cout_pad), jnp.float32),  # sum sq
        ),
        grid=(num_tiles,),
        in_specs=[
            pl.BlockSpec((tile_m, k_dim), lambda t: (t, 0)),
            pl.BlockSpec((k_dim, cout_pad), lambda t: (0, 0),
                         pipeline_mode=pl.Buffered(1)),   # constant block, 1 buffer
        ],
        out_specs=(
            pl.BlockSpec((tile_m, cout_pad), lambda t: (t, 0)),
            pl.BlockSpec((1, 8, cout_pad), lambda t: (t, 0, 0)),
            pl.BlockSpec((1, 8, cout_pad), lambda t: (t, 0, 0)),
        ),
        compiler_params=pltpu.CompilerParams(
            dimension_semantics=("parallel",),      # per-tile partial stats -> no race
            vmem_limit_bytes=budget),
        cost_estimate=pl.CostEstimate(
            flops=2 * m_pad * k_dim * cout_pad,
            transcendentals=0,
            bytes_accessed=p1_bytes),
    )(patches, w_mat)

    # --- per-channel scale/shift (tiny, computed once in the wrapper) -------
    m_true = jnp.float32(m_rows)
    ch_sum = jnp.sum(part_sum[:, 0, :], axis=0)                  # (Cout_pad,)
    ch_sumsq = jnp.sum(part_sumsq[:, 0, :], axis=0)              # (Cout_pad,)
    mean = ch_sum / m_true
    var = jnp.maximum(ch_sumsq / m_true - mean * mean, 0.0)      # biased var
    inv_std = lax.rsqrt(var + BN_EPS)
    scale = (gamma_p * inv_std).reshape(1, cout_pad)
    shift = (beta_p - mean * gamma_p * inv_std).reshape(1, cout_pad)

    # --- pass 2: fused normalize + ReLU (pure HBM streaming, big tiles) -----
    alias = {0: 0} if y_dtype == out_dtype else {}
    out_flat = pl.pallas_call(
        _bn_relu_kernel,
        out_shape=jax.ShapeDtypeStruct((m_pad, cout_pad), out_dtype),
        grid=(m_pad // tile_m2,),
        in_specs=[
            pl.BlockSpec((tile_m2, cout_pad), lambda t: (t, 0)),
            pl.BlockSpec((1, cout_pad), lambda t: (0, 0)),
            pl.BlockSpec((1, cout_pad), lambda t: (0, 0)),
        ],
        out_specs=pl.BlockSpec((tile_m2, cout_pad), lambda t: (t, 0)),
        input_output_aliases=alias,
        compiler_params=pltpu.CompilerParams(
            dimension_semantics=("parallel",),
            vmem_limit_bytes=budget),
        cost_estimate=pl.CostEstimate(
            flops=2 * m_pad * cout_pad,
            transcendentals=0,
            bytes_accessed=m_pad * cout_pad * (y_bytes + out_bytes)),
    )(y, scale, shift)

    # Drop M / channel padding, reshape back to NCHW.
    out = out_flat[:m_rows, :cout].reshape(n, ho, wo, cout)
    return jnp.transpose(out, (0, 3, 1, 2))


def _reference(x_nchw, conv_weight, bn_gamma, bn_beta, *, stride, padding):
    """Pure-JAX reference mirroring PyTorch: conv2d -> batch_norm(train) -> relu."""
    y = lax.conv_general_dilated(
        x_nchw, conv_weight,
        window_strides=(stride, stride),
        padding=[(padding, padding), (padding, padding)],
        dimension_numbers=("NCHW", "OIHW", "NCHW"))
    mean = jnp.mean(y, axis=(0, 2, 3), keepdims=True)
    var = jnp.mean((y - mean) ** 2, axis=(0, 2, 3), keepdims=True)
    g = bn_gamma.reshape(1, -1, 1, 1)
    b = bn_beta.reshape(1, -1, 1, 1)
    y = (y - mean) * lax.rsqrt(var + BN_EPS) * g + b
    return jnp.maximum(y, 0.0)


if __name__ == "__main__":
    # BasicConv2d(in_planes=4, out_planes=8, kernel_size=3, stride=1, padding=1)
    in_planes, out_planes, ksize, stride, padding = 4, 8, 3, 1, 1
    key = jax.random.PRNGKey(0)
    k_x, k_w = jax.random.split(key)

    x = jax.random.normal(k_x, (2, in_planes, 16, 16), dtype=jnp.float32)
    conv_w = 0.1 * jax.random.normal(
        k_w, (out_planes, in_planes, ksize, ksize), dtype=jnp.float32)
    # BatchNorm2d default init: weight(gamma)=1, bias(beta)=0.
    gamma = jnp.ones((out_planes,), dtype=jnp.float32)
    beta = jnp.zeros((out_planes,), dtype=jnp.float32)

    ref = _reference(x, conv_w, gamma, beta, stride=stride, padding=padding)

    # Default fast path: bf16 MXU operands + bf16 intermediate, auto tiles.
    out_fast = basic_conv2d(x, conv_w, gamma, beta,
                            stride=stride, padding=padding)
    out_fast = jax.block_until_ready(out_fast)
    assert out_fast.shape == ref.shape == (2, out_planes, 16, 16)
    assert jnp.allclose(out_fast, ref, atol=5e-2, rtol=5e-2), \
        f"bf16 path max abs err {jnp.max(jnp.abs(out_fast - ref))}"

    # Exact-precision path; tile_m=128 exercises the multi-tile pipeline
    # (M = 2*16*16 = 512 -> 4 pass-1 tiles, 1 large pass-2 tile) and the
    # pass-2 input/output aliasing (f32 intermediate == f32 output dtype).
    out_f32 = basic_conv2d(x, conv_w, gamma, beta,
                           stride=stride, padding=padding,
                           compute_dtype=jnp.float32, tile_m=128)
    out_f32 = jax.block_until_ready(out_f32)
    assert jnp.allclose(out_f32, ref, atol=1e-4, rtol=1e-4), \
        f"f32 path max abs err {jnp.max(jnp.abs(out_f32 - ref))}"

    print("KERNEL_OK")
</pallas_src>

<mosaic_0001>
module attributes {stable_mosaic.version = 11 : i64} {
  func.func @_conv_stats_kernel(%arg0: i32, %arg1: memref<512x36xbf16, #tpu.memory_space<vmem>>, %arg2: memref<36x128xbf16, #tpu.memory_space<vmem>>, %arg3: memref<512x128xbf16, #tpu.memory_space<vmem>>, %arg4: memref<1x8x128xf32, #tpu.memory_space<vmem>>, %arg5: memref<1x8x128xf32, #tpu.memory_space<vmem>>) attributes {dimension_semantics = [#tpu.dimension_semantics<parallel>], iteration_bounds = array<i64: 1>, scalar_prefetch = 0 : i64, scratch_operands = 0 : i64, tpu.core_type = #tpu.core_type<tc>, window_params = [{transform_indices = @transform_0, window_bounds = array<i64: 512, 36>}, {pipeline_mode = #tpu.pipeline_mode<synchronous>, transform_indices = @transform_1, window_bounds = array<i64: 36, 128>}, {transform_indices = @transform_2, window_bounds = array<i64: 512, 128>}, {transform_indices = @transform_3, window_bounds = array<i64: 1, 8, 128>}, {transform_indices = @transform_4, window_bounds = array<i64: 1, 8, 128>}]} {
    %c0 = arith.constant 0 : index
    %c0_0 = arith.constant 0 : index
    %0 = vector.load %arg1[%c0, %c0_0] : memref<512x36xbf16, #tpu.memory_space<vmem>>, vector<512x36xbf16>
    %c0_1 = arith.constant 0 : index
    %c0_2 = arith.constant 0 : index
    %1 = vector.load %arg2[%c0_1, %c0_2] : memref<36x128xbf16, #tpu.memory_space<vmem>>, vector<36x128xbf16>
    %cst = arith.constant dense<0.000000e+00> : vector<512x128xf32>
    %2 = tpu.matmul %0, %1, %cst {dimension_numbers = #tpu.dot_dimension_numbers<[1], [0], [0], [1], [0, 0, 1, 1], [], []>} : vector<512x36xbf16>, vector<36x128xbf16>, vector<512x128xf32> -> vector<512x128xf32>
    %3 = arith.truncf %2 : vector<512x128xf32> to vector<512x128xbf16>
    %c0_3 = arith.constant 0 : index
    %c0_4 = arith.constant 0 : index
    %4 = vector.load %arg3[%c0_3, %c0_4] : memref<512x128xbf16, #tpu.memory_space<vmem>>, vector<512x128xbf16>
    tpu.vector_store %arg3[%c0_3, %c0_4], %3 {strides = array<i32>} : memref<512x128xbf16, #tpu.memory_space<vmem>>, vector<512x128xbf16>,
    %cst_5 = arith.constant dense<0.000000e+00> : vector<128xf32>
    %5 = vector.multi_reduction <add>, %2, %cst_5 [0] : vector<512x128xf32> to vector<128xf32>
    %6 = vector.shape_cast %5 : vector<128xf32> to vector<1x1x128xf32>
    %7 = vector.broadcast %6 : vector<1x1x128xf32> to vector<1x8x128xf32>
    %c0_6 = arith.constant 0 : index
    %c0_7 = arith.constant 0 : index
    %c0_8 = arith.constant 0 : index
    %8 = vector.load %arg4[%c0_6, %c0_7, %c0_8] : memref<1x8x128xf32, #tpu.memory_space<vmem>>, vector<1x8x128xf32>
    tpu.vector_store %arg4[%c0_6, %c0_7, %c0_8], %7 {strides = array<i32>} : memref<1x8x128xf32, #tpu.memory_space<vmem>>, vector<1x8x128xf32>,
    %9 = arith.mulf %2, %2 : vector<512x128xf32>
    %cst_9 = arith.constant dense<0.000000e+00> : vector<128xf32>
    %10 = vector.multi_reduction <add>, %9, %cst_9 [0] : vector<512x128xf32> to vector<128xf32>
    %11 = vector.shape_cast %10 : vector<128xf32> to vector<1x1x128xf32>
    %12 = vector.broadcast %11 : vector<1x1x128xf32> to vector<1x8x128xf32>
    %c0_10 = arith.constant 0 : index
    %c0_11 = arith.constant 0 : index
    %c0_12 = arith.constant 0 : index
    %13 = vector.load %arg5[%c0_10, %c0_11, %c0_12] : memref<1x8x128xf32, #tpu.memory_space<vmem>>, vector<1x8x128xf32>
    tpu.vector_store %arg5[%c0_10, %c0_11, %c0_12], %12 {strides = array<i32>} : memref<1x8x128xf32, #tpu.memory_space<vmem>>, vector<1x8x128xf32>,
    return
  }
  func.func @transform_0(%arg0: i32) -> (i32, i32) {
    %c0_i32 = arith.constant 0 : i32
    %c0_i32_0 = arith.constant 0 : i32
    return %arg0, %c0_i32 : i32, i32
  }
  func.func @transform_1(%arg0: i32) -> (i32, i32) {
    %c0_i32 = arith.constant 0 : i32
    %c0_i32_0 = arith.constant 0 : i32
    %c0_i32_1 = arith.constant 0 : i32
    return %c0_i32, %c0_i32_0 : i32, i32
  }
  func.func @transform_2(%arg0: i32) -> (i32, i32) {
    %c0_i32 = arith.constant 0 : i32
    %c0_i32_0 = arith.constant 0 : i32
    return %arg0, %c0_i32 : i32, i32
  }
  func.func @transform_3(%arg0: i32) -> (i32, i32, i32) {
    %c0_i32 = arith.constant 0 : i32
    %c0_i32_0 = arith.constant 0 : i32
    %c0_i32_1 = arith.constant 0 : i32
    return %arg0, %c0_i32, %c0_i32_0 : i32, i32, i32
  }
  func.func @transform_4(%arg0: i32) -> (i32, i32, i32) {
    %c0_i32 = arith.constant 0 : i32
    %c0_i32_0 = arith.constant 0 : i32
    %c0_i32_1 = arith.constant 0 : i32
    return %arg0, %c0_i32, %c0_i32_0 : i32, i32, i32
  }
}

</mosaic_0001>

<bundles_post_ra>
// kernel: tpu_custom_call.1
= control target key start
LH: loop header
LB: loop body
LE: loop exit
PB: predicated region body
PF: predicated region fallthrough
CT: control target
= control target key end

     0   :  { %10 = vsyncpa [#allocation3], 0  ;;  %vm261_vm0 = vcmask 293888   ;;  %vm358_vm1 = vcmask 1041408   ;;  %s2222_s0 = inlined_call_operand.vmem [shape: bf16[512,36], index: 0, kind: input, shape index: {}]   ;;  %s2223_s1 = inlined_call_operand.vmem [shape: bf16[36,128], index: 1, kind: input, shape index: {}]   ;;  %s2224_s2 = inlined_call_operand.hbm [shape: bf16[512,128], index: 2, kind: output, shape index: {0}]   ;;  %s2225_s3 = inlined_call_operand.hbm [shape: f32[1,8,128], index: 3, kind: output, shape index: {1}]   ;;  %s2226_s4 = inlined_call_operand.hbm [shape: f32[1,8,128], index: 4, kind: output, shape index: {2}]  }
   0x1   :  { %v1722_v0 = vld [vmem:[%s2223_s1] sm:$0xff]   ;;  %v1723_v1 = vld [vmem:[%s2223_s1 + $0x8] sm:$0xff]   ;;  %v1724_v2 = vld [vmem:[%s2223_s1 + $0x10] ss:$0 sps:$4 sm:$0x33]  }
   0x2   :  { %1639 = vmatprep.subr.bf16.mxu0 %v1722_v0  ;;  %v1725_v3 = vld [vmem:[%s2222_s0] sm:$0xff]   ;;  %1709 = vmatprep.subr.bf16.mxu1 %v1722_v0  ;;  %v360_v4 = vsel %vm358_vm1, %v1724_v2, 0  ;;  %v1726_v5 = vld [vmem:[%s2222_s0 + $0x8] sm:$0xff]   ;;  %v1727_v6 = vld [vmem:[%s2222_s0 + $0x10] sm:$0xff]  }
   0x3   :  { %1640 = vmatpush3.bf16.msra.mxu0 %v1722_v0  ;;  %1712 = vmatpush3.bf16.msra.mxu1 %v1722_v0  ;;  %v1728_v7 = vld [vmem:[%s2222_s0 + $0x18] sm:$0xff]   ;;  %v1729_v8 = vld [vmem:[%s2222_s0 + $0x20] sm:$0xff]   ;;  %v1742_v10 = vld [vmem:[%s2222_s0 + $0x88] sm:$0xff]  }
   0x4   :  { %1641 = vmatprep.subr.bf16.mxu0 %v1723_v1  ;;  %1645 = vmatprep.mubr.msk.bf16.mxu0 %vm261_vm0, %v1725_v3  ;;  %v1741_v9 = vld [vmem:[%s2222_s0 + $0x80] sm:$0xff]   ;;  %v1743_v11 = vld [vmem:[%s2222_s0 + $0x90] sm:$0xff]   ;;  %v1730_v12 = vld [vmem:[%s2222_s0 + $0x28] sm:$0xff]  }
   0x5   :  { %1710 = vmatprep.subr.bf16.mxu1 %v1723_v1  ;;  %1677 = vmatprep.mubr.msk.bf16.mxu1 %vm261_vm0, %v1741_v9  ;;  %v1731_v13 = vld [vmem:[%s2222_s0 + $0x30] sm:$0xff]   ;;  %v1744_v14 = vld [vmem:[%s2222_s0 + $0x98] sm:$0xff]   ;;  %v1745_v15 = vld [vmem:[%s2222_s0 + $0xa0] sm:$0xff]  }
   0x6   :  { %v1732_v16 = vld [vmem:[%s2222_s0 + $0x38] sm:$0xff]   ;;  %v1746_v17 = vld [vmem:[%s2222_s0 + $0xa8] sm:$0xff]  }
   0x7   :  { %1642 = vmatpush3.bf16.msra.mxu0 %v1723_v1  ;;  %1713 = vmatpush3.bf16.msra.mxu1 %v1723_v1 }
   0x8   :  { %1715 = vmatprep.subr.msk.bf16.mxu0 %vm358_vm1, %v1724_v2  ;;  %1716 = vmatprep.subr.msk.bf16.mxu1 %vm358_vm1, %v1724_v2 }
   0xb   :  { %1644 = vmatpush3.bf16.msra.mxu0 %v360_v4  ;;  %1714 = vmatpush3.bf16.msra.mxu1 %v360_v4 }
   0xe   :  { %1646 = vmatmul.mubr.msk.bf16.vlgmr.msra.gmra.mrb[0].mxu0 %vm261_vm0, %v1726_v5  ;;  %1678 = vmatmul.mubr.msk.bf16.vlgmr.msra.gmra.mrb[0].mxu1 %vm261_vm0, %v1742_v10 }
   0xf   :  { %1649 = vmatprep.mubr.msk.bf16.mxu0 %vm261_vm0, %v1727_v6  ;;  %1681 = vmatprep.mubr.msk.bf16.mxu1 %vm261_vm0, %v1743_v11 }
  0x16   :  { %1650 = vmatmul.mubr.msk.bf16.gmra.mrb[4].mxu0 %vm261_vm0, %v1728_v7  ;;  %1682 = vmatmul.mubr.msk.bf16.gmra.mrb[4].mxu1 %vm261_vm0, %v1744_v14 }
  0x17   :  { %1653 = vmatprep.mubr.msk.bf16.mxu0 %vm261_vm0, %v1729_v8  ;;  %1685 = vmatprep.mubr.msk.bf16.mxu1 %vm261_vm0, %v1745_v15 }
  0x1e   :  { %1654 = vmatmul.mubr.msk.bf16.gmra.mrb[8].mxu0 %vm261_vm0, %v1730_v12 }
  0x1f   :  { %1657 = vmatprep.mubr.msk.bf16.mxu0 %vm261_vm0, %v1731_v13 }
  0x20   :  { %11 = vsyncpa [#allocation5], 0  ;;  %v1733_v18 = vld [vmem:[%s2222_s0 + $0x40] sm:$0xff]   ;;  %v1747_v19 = vld [vmem:[%s2222_s0 + $0xb0] sm:$0xff]   ;;  %1686 = vmatmul.mubr.msk.bf16.gmra.mrb[8].mxu1 %vm261_vm0, %v1746_v17 }
  0x21   :  { %1689 = vmatprep.mubr.msk.bf16.mxu1 %vm261_vm0, %v1747_v19  ;;  %v1734_v20 = vld [vmem:[%s2222_s0 + $0x48] sm:$0xff]   ;;  %v1748_v21 = vld [vmem:[%s2222_s0 + $0xb8] sm:$0xff]   ;;  %v1735_v22 = vld [vmem:[%s2222_s0 + $0x50] sm:$0xff]  }
  0x22   :  { %v1749_v23 = vld [vmem:[%s2222_s0 + $0xc0] sm:$0xff]   ;;  %v1736_v24 = vld [vmem:[%s2222_s0 + $0x58] sm:$0xff]   ;;  %v1750_v25 = vld [vmem:[%s2222_s0 + $0xc8] sm:$0xff]  }
  0x23   :  { %v1737_v26 = vld [vmem:[%s2222_s0 + $0x60] sm:$0xff]   ;;  %v1751_v27 = vld [vmem:[%s2222_s0 + $0xd0] sm:$0xff]   ;;  %v1738_v28 = vld [vmem:[%s2222_s0 + $0x68] sm:$0xff]  }
  0x24   :  { %v1752_v29 = vld [vmem:[%s2222_s0 + $0xd8] sm:$0xff]   ;;  %v1739_v30 = vld [vmem:[%s2222_s0 + $0x70] sm:$0xff]   ;;  %v1753_v31 = vld [vmem:[%s2222_s0 + $0xe0] sm:$0xff]  }
  0x25   :  { %v1740_v32 = vld [vmem:[%s2222_s0 + $0x78] sm:$0xff]   ;;  %v1754_v33 = vld [vmem:[%s2222_s0 + $0xe8] sm:$0xff]   ;;  %v1755_v34 = vld [vmem:[%s2222_s0 + $0xf0] sm:$0xff]  }
  0x26   :  { %1658 = vmatmul.mubr.msk.bf16.gmra.mrb[12].mxu0 %vm261_vm0, %v1732_v16  ;;  %v1756_v35 = vld [vmem:[%s2222_s0 + $0xf8] sm:$0xff]   ;;  %s1827_s0 = smov [#allocation2]  }
  0x27   :  { %1661 = vmatprep.mubr.msk.bf16.mxu0 %vm261_vm0, %v1733_v18  ;;  %s1180_s30 = sshll.u32 %s1827_s0, 4  ;;  %s1181_s30 = int_to_ptr.vmem [resolvable:$true] %s1180_s30 }
  0x28   :  { %1690 = vmatmul.mubr.msk.bf16.gmra.mrb[12].mxu1 %vm261_vm0, %v1748_v21  ;;  %s1757_s5 = scalar_lea.vmem %s1181_s30, 4096  ;;  %p1762_p1 = scmp.lt.s32.totalorder %s1181_s30, %s1181_s30 }
  0x29   :  { %1693 = vmatprep.mubr.msk.bf16.mxu1 %vm261_vm0, %v1749_v23  ;;  %p1758_p0 = scmp.ne.s32.totalorder %s1181_s30, %s1757_s5  ;;  %p1763_p2 = scmp.lt.s32.totalorder %s1757_s5, %s1757_s5 }
  0x2b   :  { %p1764_p3 = por %p1763_p2, %p1762_p1 }
  0x2d   :  { %p1765_p4 = pnand %p1764_p3, %p1758_p0 }
  0x2e   :  { %1662 = vmatmul.mubr.msk.bf16.gmra.mrb[16].mxu0 %vm261_vm0, %v1734_v20 }
  0x2f   :  { %1665 = vmatprep.mubr.msk.bf16.mxu0 %vm261_vm0, %v1735_v22 }
  0x30   :  { %1694 = vmatmul.mubr.msk.bf16.gmra.mrb[16].mxu1 %vm261_vm0, %v1750_v25 }
  0x31   :  { %1697 = vmatprep.mubr.msk.bf16.mxu1 %vm261_vm0, %v1751_v27 }
  0x36   :  { %1666 = vmatmul.mubr.msk.bf16.gmra.mrb[20].mxu0 %vm261_vm0, %v1736_v24 }
  0x37   :  { %1669 = vmatprep.mubr.msk.bf16.mxu0 %vm261_vm0, %v1737_v26 }
  0x38   :  { %1698 = vmatmul.mubr.msk.bf16.gmra.mrb[20].mxu1 %vm261_vm0, %v1752_v29 }
  0x39   :  { %1701 = vmatprep.mubr.msk.bf16.mxu1 %vm261_vm0, %v1753_v31 }
  0x3e   :  { %1670 = vmatmul.mubr.msk.bf16.gmra.mrb[24].mxu0 %vm261_vm0, %v1738_v28 }
  0x3f   :  { %1673 = vmatprep.mubr.msk.bf16.mxu0 %vm261_vm0, %v1739_v30 }
  0x40   :  { %1702 = vmatmul.mubr.msk.bf16.gmra.mrb[24].mxu1 %vm261_vm0, %v1754_v33 }
  0x41   :  { %1705 = vmatprep.mubr.msk.bf16.mxu1 %vm261_vm0, %v1755_v34 }
  0x46   :  { %1674 = vmatmul.mubr.msk.bf16.gmra.mrb[28].mxu0 %vm261_vm0, %v1740_v32 }
  0x48   :  { %1706 = vmatmul.mubr.msk.bf16.gmra.mrb[28].mxu1 %vm261_vm0, %v1756_v35 }
  0xe1   :  { %v1647_v36 = vpop.f32.mrb[0].mxu0  ;;  %v1994_v52 = vpop.f32.mrb[0].mxu1 }
  0xe2   :  { %v396_v37 = vpop.f32.mrb[1].mxu0  ;;  %v1043_v45 = vmul.f32 %v1647_v36, %v1647_v36  ;;  %v1996_v54 = vpop.f32.mrb[1].mxu1 }
  0xe3   :  { %v1648_v38 = vpop.f32.mrb[2].mxu0  ;;  %v1041_v41 = vmul.f32 %v396_v37, %v396_v37  ;;  %v1998_v59 = vpop.f32.mrb[2].mxu1 }
  0xe4   :  { %v1421_v39 = vpack.c.bf16 %v1648_v38, %v1647_v36  ;;  %v399_v40 = vpop.f32.mrb[3].mxu0  ;;  %v1044_v48 = vmul.f32 %v1648_v38, %v1648_v38  ;;  %v1501_v62 = vpack.c.bf16 %v1998_v59, %v1994_v52  ;;  %v2002_v63 = vpop.f32.mrb[3].mxu1 }
  0xe5   :  { %v1416_v42 = vpack.c.bf16 %v399_v40, %v396_v37  ;;  %v971_v43 = vadd.f32 %v399_v40, %v396_v37  ;;  %v1042_v44 = vmul.f32 %v399_v40, %v399_v40  ;;  %v1496_v4 = vpack.c.bf16 %v2002_v63, %v1996_v54 }
  0xe6   :  { %1573 = vst [vmem:[#allocation2 + $0x8] sm:$0xff] %v1421_v39   ;;  %1589 = vst [vmem:[#allocation2 + $0x88] sm:$0xff] %v1501_v62  }
  0xe7   :  { %1417 = vst [vmem:[#allocation2] sm:$0xff] %v1416_v42   ;;  %v972_v46 = vadd.f32 %v1647_v36, %v971_v43  ;;  %v1105_v47 = vadd.f32 %v1042_v44, %v1041_v41  ;;  %1588 = vst [vmem:[#allocation2 + $0x80] sm:$0xff] %v1496_v4  }
  0xe9   :  { %v1106_v49 = vadd.f32 %v1105_v47, %v1043_v45  ;;  %v1651_v50 = vpop.f32.mrb[4].mxu0  ;;  %v973_v51 = vadd.f32 %v1648_v38, %v972_v46  ;;  %v2006_v12 = vpop.f32.mrb[4].mxu1 }
  0xea   :  { %v412_v53 = vpop.f32.mrb[5].mxu0  ;;  %v1047_v5 = vmul.f32 %v1651_v50, %v1651_v50  ;;  %v2008_v14 = vpop.f32.mrb[5].mxu1 }
  0xeb   :  { %v974_v55 = vadd.f32 %v973_v51, %v412_v53  ;;  %v1045_v56 = vmul.f32 %v412_v53, %v412_v53  ;;  %v1107_v57 = vadd.f32 %v1106_v49, %v1044_v48  ;;  %v1652_v58 = vpop.f32.mrb[6].mxu0  ;;  %v2010_v19 = vpop.f32.mrb[6].mxu1 }
  0xec   :  { %v1431_v60 = vpack.c.bf16 %v1652_v58, %v1651_v50  ;;  %v415_v61 = vpop.f32.mrb[7].mxu0  ;;  %v1048_v8 = vmul.f32 %v1652_v58, %v1652_v58  ;;  %v1511_v22 = vpack.c.bf16 %v2010_v19, %v2006_v12  ;;  %v2014_v23 = vpop.f32.mrb[7].mxu1 }
  0xed   :  { %v1108_v0 = vadd.f32 %v1107_v57, %v1045_v56  ;;  %v1426_v1 = vpack.c.bf16 %v415_v61, %v412_v53  ;;  %v975_v2 = vadd.f32 %v974_v55, %v415_v61  ;;  %v1046_v3 = vmul.f32 %v415_v61, %v415_v61 }
  0xee   :  { %1575 = vst [vmem:[#allocation2 + $0x18] sm:$0xff] %v1431_v60   ;;  %1591 = vst [vmem:[#allocation2 + $0x98] sm:$0xff] %v1511_v22   ;;  %v1506_v28 = vpack.c.bf16 %v2014_v23, %v2008_v14 }
  0xef   :  { %1574 = vst [vmem:[#allocation2 + $0x10] sm:$0xff] %v1426_v1   ;;  %v976_v6 = vadd.f32 %v1651_v50, %v975_v2  ;;  %v1109_v7 = vadd.f32 %v1108_v0, %v1046_v3 }
  0xf0   :  { %1590 = vst [vmem:[#allocation2 + $0x90] sm:$0xff] %v1506_v28  }
  0xf1   :  { %v1110_v9 = vadd.f32 %v1109_v7, %v1047_v5  ;;  %v1655_v10 = vpop.f32.mrb[8].mxu0  ;;  %v977_v11 = vadd.f32 %v1652_v58, %v976_v6 }
  0xf2   :  { %v428_v13 = vpop.f32.mrb[9].mxu0  ;;  %v1051_v29 = vmul.f32 %v1655_v10, %v1655_v10 }
  0xf3   :  { %v978_v15 = vadd.f32 %v977_v11, %v428_v13  ;;  %v1049_v16 = vmul.f32 %v428_v13, %v428_v13  ;;  %v1111_v17 = vadd.f32 %v1110_v9, %v1048_v8  ;;  %v1656_v18 = vpop.f32.mrb[10].mxu0  ;;  %v2018_v36 = vpop.f32.mrb[8].mxu1 }
  0xf4   :  { %v1441_v20 = vpack.c.bf16 %v1656_v18, %v1655_v10  ;;  %v431_v21 = vpop.f32.mrb[11].mxu0  ;;  %v1052_v32 = vmul.f32 %v1656_v18, %v1656_v18  ;;  %v2020_v38 = vpop.f32.mrb[9].mxu1 }
  0xf5   :  { %v1112_v24 = vadd.f32 %v1111_v17, %v1049_v16  ;;  %v1436_v25 = vpack.c.bf16 %v431_v21, %v428_v13  ;;  %v979_v26 = vadd.f32 %v978_v15, %v431_v21  ;;  %v1050_v27 = vmul.f32 %v431_v21, %v431_v21  ;;  %v2022_v43 = vpop.f32.mrb[10].mxu1 }
  0xf6   :  { %1577 = vst [vmem:[#allocation2 + $0x28] sm:$0xff] %v1441_v20   ;;  %v1521_v46 = vpack.c.bf16 %v2022_v43, %v2018_v36  ;;  %v2026_v47 = vpop.f32.mrb[11].mxu1 }
  0xf7   :  { %1576 = vst [vmem:[#allocation2 + $0x20] sm:$0xff] %v1436_v25   ;;  %v980_v30 = vadd.f32 %v1655_v10, %v979_v26  ;;  %v1113_v31 = vadd.f32 %v1112_v24, %v1050_v27  ;;  %v1516_v53 = vpack.c.bf16 %v2026_v47, %v2020_v38 }
  0xf8   :  { %1593 = vst [vmem:[#allocation2 + $0xa8] sm:$0xff] %v1521_v46  }
  0xf9   :  { %v1114_v33 = vadd.f32 %v1113_v31, %v1051_v29  ;;  %v1659_v34 = vpop.f32.mrb[12].mxu0  ;;  %v981_v35 = vadd.f32 %v1656_v18, %v980_v30  ;;  %1592 = vst [vmem:[#allocation2 + $0xa0] sm:$0xff] %v1516_v53  }
  0xfa   :  { %v444_v37 = vpop.f32.mrb[13].mxu0  ;;  %v1055_v55 = vmul.f32 %v1659_v34, %v1659_v34 }
  0xfb   :  { %v982_v39 = vadd.f32 %v981_v35, %v444_v37  ;;  %v1053_v40 = vmul.f32 %v444_v37, %v444_v37  ;;  %v1115_v41 = vadd.f32 %v1114_v33, %v1052_v32  ;;  %v1660_v42 = vpop.f32.mrb[14].mxu0  ;;  %v2030_v0 = vpop.f32.mrb[12].mxu1 }
  0xfc   :  { %v1451_v44 = vpack.c.bf16 %v1660_v42, %v1659_v34  ;;  %v447_v45 = vpop.f32.mrb[15].mxu0  ;;  %v1056_v58 = vmul.f32 %v1660_v42, %v1660_v42  ;;  %v2032_v2 = vpop.f32.mrb[13].mxu1 }
  0xfd   :  { %v1116_v48 = vadd.f32 %v1115_v41, %v1053_v40  ;;  %v1446_v49 = vpack.c.bf16 %v447_v45, %v444_v37  ;;  %v983_v50 = vadd.f32 %v982_v39, %v447_v45  ;;  %v1054_v51 = vmul.f32 %v447_v45, %v447_v45  ;;  %v2034_v7 = vpop.f32.mrb[14].mxu1 }
  0xfe   :  { %1579 = vst [vmem:[#allocation2 + $0x38] sm:$0xff] %v1451_v44   ;;  %v1531_v10 = vpack.c.bf16 %v2034_v7, %v2030_v0  ;;  %v2038_v11 = vpop.f32.mrb[15].mxu1 }
  0xff   :  { %1578 = vst [vmem:[#allocation2 + $0x30] sm:$0xff] %v1446_v49   ;;  %v984_v56 = vadd.f32 %v1659_v34, %v983_v50  ;;  %v1117_v57 = vadd.f32 %v1116_v48, %v1054_v51  ;;  %v1526_v18 = vpack.c.bf16 %v2038_v11, %v2032_v2 }
 0x100   :  { %1595 = vst [vmem:[#allocation2 + $0xb8] sm:$0xff] %v1531_v10  }
 0x101   :  { %v1118_v60 = vadd.f32 %v1117_v57, %v1055_v55  ;;  %v1663_v61 = vpop.f32.mrb[16].mxu0  ;;  %v985_v62 = vadd.f32 %v1660_v42, %v984_v56  ;;  %1594 = vst [vmem:[#allocation2 + $0xb0] sm:$0xff] %v1526_v18  }
 0x102   :  { %v460_v1 = vpop.f32.mrb[17].mxu0  ;;  %v1059_v20 = vmul.f32 %v1663_v61, %v1663_v61 }
 0x103   :  { %v986_v3 = vadd.f32 %v985_v62, %v460_v1  ;;  %v1057_v4 = vmul.f32 %v460_v1, %v460_v1  ;;  %v1119_v5 = vadd.f32 %v1118_v60, %v1056_v58  ;;  %v1664_v6 = vpop.f32.mrb[18].mxu0  ;;  %v2042_v28 = vpop.f32.mrb[16].mxu1 }
 0x104   :  { %v1461_v8 = vpack.c.bf16 %v1664_v6, %v1663_v61  ;;  %v463_v9 = vpop.f32.mrb[19].mxu0  ;;  %v1060_v24 = vmul.f32 %v1664_v6, %v1664_v6  ;;  %v2044_v30 = vpop.f32.mrb[17].mxu1 }
 0x105   :  { %v1120_v13 = vadd.f32 %v1119_v5, %v1057_v4  ;;  %v1456_v15 = vpack.c.bf16 %v463_v9, %v460_v1  ;;  %v987_v16 = vadd.f32 %v986_v3, %v463_v9  ;;  %v1058_v17 = vmul.f32 %v463_v9, %v463_v9  ;;  %v2046_v35 = vpop.f32.mrb[18].mxu1 }
 0x106   :  { %1581 = vst [vmem:[#allocation2 + $0x48] sm:$0xff] %v1461_v8   ;;  %v1541_v40 = vpack.c.bf16 %v2046_v35, %v2042_v28  ;;  %v2050_v41 = vpop.f32.mrb[19].mxu1 }
 0x107   :  { %1580 = vst [vmem:[#allocation2 + $0x40] sm:$0xff] %v1456_v15   ;;  %v988_v21 = vadd.f32 %v1663_v61, %v987_v16  ;;  %v1121_v22 = vadd.f32 %v1120_v13, %v1058_v17  ;;  %v1536_v48 = vpack.c.bf16 %v2050_v41, %v2044_v30 }
 0x108   :  { %1597 = vst [vmem:[#allocation2 + $0xc8] sm:$0xff] %v1541_v40  }
 0x109   :  { %v1122_v25 = vadd.f32 %v1121_v22, %v1059_v20  ;;  %v1667_v26 = vpop.f32.mrb[20].mxu0  ;;  %v989_v27 = vadd.f32 %v1664_v6, %v988_v21  ;;  %1596 = vst [vmem:[#allocation2 + $0xc0] sm:$0xff] %v1536_v48  }
 0x10a   :  { %v476_v29 = vpop.f32.mrb[21].mxu0  ;;  %v1063_v49 = vmul.f32 %v1667_v26, %v1667_v26 }
 0x10b   :  { %v990_v31 = vadd.f32 %v989_v27, %v476_v29  ;;  %v1061_v32 = vmul.f32 %v476_v29, %v476_v29  ;;  %v1123_v33 = vadd.f32 %v1122_v25, %v1060_v24  ;;  %v1668_v34 = vpop.f32.mrb[22].mxu0  ;;  %v2054_v58 = vpop.f32.mrb[20].mxu1 }
 0x10c   :  { %v1471_v37 = vpack.c.bf16 %v1668_v34, %v1667_v26  ;;  %v479_v39 = vpop.f32.mrb[23].mxu0  ;;  %v1064_v53 = vmul.f32 %v1668_v34, %v1668_v34  ;;  %v2056_v61 = vpop.f32.mrb[21].mxu1 }
 0x10d   :  { %v1124_v42 = vadd.f32 %v1123_v33, %v1061_v32  ;;  %v1466_v44 = vpack.c.bf16 %v479_v39, %v476_v29  ;;  %v991_v45 = vadd.f32 %v990_v31, %v479_v39  ;;  %v1062_v46 = vmul.f32 %v479_v39, %v479_v39  ;;  %v2058_v5 = vpop.f32.mrb[22].mxu1 }
 0x10e   :  { %1583 = vst [vmem:[#allocation2 + $0x58] sm:$0xff] %v1471_v37   ;;  %v1551_v9 = vpack.c.bf16 %v2058_v5, %v2054_v58  ;;  %v2062_v10 = vpop.f32.mrb[23].mxu1 }
 0x10f   :  { %1582 = vst [vmem:[#allocation2 + $0x50] sm:$0xff] %v1466_v44   ;;  %v992_v50 = vadd.f32 %v1667_v26, %v991_v45  ;;  %v1125_v51 = vadd.f32 %v1124_v42, %v1062_v46  ;;  %v1546_v18 = vpack.c.bf16 %v2062_v10, %v2056_v61 }
 0x110   :  { %1599 = vst [vmem:[#allocation2 + $0xd8] sm:$0xff] %v1551_v9  }
 0x111   :  { %v1126_v55 = vadd.f32 %v1125_v51, %v1063_v49  ;;  %v1671_v56 = vpop.f32.mrb[24].mxu0  ;;  %v993_v57 = vadd.f32 %v1668_v34, %v992_v50  ;;  %1598 = vst [vmem:[#allocation2 + $0xd0] sm:$0xff] %v1546_v18  }
 0x112   :  { %v492_v60 = vpop.f32.mrb[25].mxu0  ;;  %v1067_v20 = vmul.f32 %v1671_v56, %v1671_v56 }
 0x113   :  { %v994_v62 = vadd.f32 %v993_v57, %v492_v60  ;;  %v1065_v1 = vmul.f32 %v492_v60, %v492_v60  ;;  %v1127_v3 = vadd.f32 %v1126_v55, %v1064_v53  ;;  %v1672_v4 = vpop.f32.mrb[26].mxu0  ;;  %v2066_v29 = vpop.f32.mrb[24].mxu1 }
 0x114   :  { %v1481_v6 = vpack.c.bf16 %v1672_v4, %v1671_v56  ;;  %v495_v8 = vpop.f32.mrb[27].mxu0  ;;  %v1068_v24 = vmul.f32 %v1672_v4, %v1672_v4  ;;  %v2068_v32 = vpop.f32.mrb[25].mxu1 }
 0x115   :  { %v1128_v13 = vadd.f32 %v1127_v3, %v1065_v1  ;;  %v1476_v15 = vpack.c.bf16 %v495_v8, %v492_v60  ;;  %v995_v16 = vadd.f32 %v994_v62, %v495_v8  ;;  %v1066_v17 = vmul.f32 %v495_v8, %v495_v8  ;;  %v2070_v40 = vpop.f32.mrb[26].mxu1 }
 0x116   :  { %1585 = vst [vmem:[#allocation2 + $0x68] sm:$0xff] %v1481_v6   ;;  %v1561_v45 = vpack.c.bf16 %v2070_v40, %v2066_v29  ;;  %v2074_v46 = vpop.f32.mrb[27].mxu1  ;;  %v1073_v3 = vmul.f32 %v1996_v54, %v1996_v54 }
 0x117   :  { %1584 = vst [vmem:[#allocation2 + $0x60] sm:$0xff] %v1476_v15   ;;  %v996_v21 = vadd.f32 %v1671_v56, %v995_v16  ;;  %v1129_v22 = vadd.f32 %v1128_v13, %v1066_v17  ;;  %v1556_v53 = vpack.c.bf16 %v2074_v46, %v2068_v32 }
 0x118   :  { %1601 = vst [vmem:[#allocation2 + $0xe8] sm:$0xff] %v1561_v45  }
 0x119   :  { %v1130_v25 = vadd.f32 %v1129_v22, %v1067_v20  ;;  %v1675_v26 = vpop.f32.mrb[28].mxu0  ;;  %v997_v27 = vadd.f32 %v1672_v4, %v996_v21  ;;  %1600 = vst [vmem:[#allocation2 + $0xe0] sm:$0xff] %v1556_v53   ;;  %v1074_v20 = vmul.f32 %v2002_v63, %v2002_v63 }
 0x11a   :  { %v508_v31 = vpop.f32.mrb[29].mxu0  ;;  %v1071_v55 = vmul.f32 %v1675_v26, %v1675_v26 }
 0x11b   :  { %v998_v33 = vadd.f32 %v997_v27, %v508_v31  ;;  %v1069_v34 = vmul.f32 %v508_v31, %v508_v31  ;;  %v1131_v37 = vadd.f32 %v1130_v25, %v1068_v24  ;;  %v1676_v39 = vpop.f32.mrb[30].mxu0  ;;  %v2080_v4 = vpop.f32.mrb[28].mxu1 }
 0x11c   :  { %v1491_v42 = vpack.c.bf16 %v1676_v39, %v1675_v26  ;;  %v511_v44 = vpop.f32.mrb[31].mxu0  ;;  %v1072_v60 = vmul.f32 %v1676_v39, %v1676_v39  ;;  %v2082_v6 = vpop.f32.mrb[29].mxu1 }
 0x11d   :  { %v1132_v48 = vadd.f32 %v1131_v37, %v1069_v34  ;;  %v1486_v49 = vpack.c.bf16 %v511_v44, %v508_v31  ;;  %v999_v50 = vadd.f32 %v998_v33, %v511_v44  ;;  %v1070_v51 = vmul.f32 %v511_v44, %v511_v44  ;;  %v2085_v13 = vpop.f32.mrb[30].mxu1 }
 0x11e   :  { %1587 = vst [vmem:[#allocation2 + $0x78] sm:$0xff] %v1491_v42   ;;  %v1571_v15 = vpack.c.bf16 %v2085_v13, %v2080_v4  ;;  %v2089_v16 = vpop.f32.mrb[31].mxu1 }
 0x11f   :  { %1586 = vst [vmem:[#allocation2 + $0x70] sm:$0xff] %v1486_v49   ;;  %v1000_v56 = vadd.f32 %v1675_v26, %v999_v50  ;;  %v1133_v57 = vadd.f32 %v1132_v48, %v1070_v51  ;;  %v1566_v21 = vpack.c.bf16 %v2089_v16, %v2082_v6 }
 0x120   :  { %1603 = vst [vmem:[#allocation2 + $0xf8] sm:$0xff] %v1571_v15  }
 0x121   :  { %v1134_v62 = vadd.f32 %v1133_v57, %v1071_v55  ;;  %v1001_v1 = vadd.f32 %v1676_v39, %v1000_v56  ;;  %1602 = vst [vmem:[#allocation2 + $0xf0] sm:$0xff] %v1566_v21  }
 0x123   :  { %v1002_v8 = vadd.f32 %v1001_v1, %v1996_v54  ;;  %v1135_v9 = vadd.f32 %v1134_v62, %v1072_v60  ;;  %v1075_v54 = vmul.f32 %v1994_v52, %v1994_v52 }
 0x125   :  { %v1136_v17 = vadd.f32 %v1135_v9, %v1073_v3  ;;  %v1003_v18 = vadd.f32 %v1002_v8, %v2002_v63 }
 0x127   :  { %v1004_v22 = vadd.f32 %v1994_v52, %v1003_v18  ;;  %v1137_v24 = vadd.f32 %v1136_v17, %v1074_v20 }
 0x128   :  { %1768 = shalt.err (!%p1765_p4)
}
 0x129   :  { %s1769_s8 = scalar_lea.hbm %s2224_s2, 4096 }
 0x12a   :  { %p1770_p5 = scmp.ne.s32.totalorder %s2224_s2, %s1769_s8  ;;  %p1773_p6 = scmp.lt.u32.totalorder %s1769_s8, %s2224_s2 }
 0x12c   :  { %p1775_p7 = pnand %p1773_p6, %p1770_p5 }
 0x12e   :  { %1778 = shalt.err (!%p1775_p7)
}
 0x12f   :  { %s1828_s13 = smov 64   ;;  %s1829_s14 = smov 4   ;;  %v1076_v52 = vmul.f32 %v1998_v59, %v1998_v59  ;;  %v1138_v63 = vadd.f32 %v1137_v24, %v1075_v54  ;;  %v1005_v25 = vadd.f32 %v1998_v59, %v1004_v22  ;;  %v1077_v26 = vmul.f32 %v2008_v14, %v2008_v14 }
 0x130   :  { %1186 = dma.vmem_to_hbm [thread:$0]  %s1181_s30, 4096, %s2224_s2, [#allocation3], %s1828_s13, %s1828_s13, %s1829_s14   ;;  %v1078_v37 = vmul.f32 %v2014_v23, %v2014_v23  ;;  %v1079_v39 = vmul.f32 %v2006_v12, %v2006_v12  ;;  %v1080_v59 = vmul.f32 %v2010_v19, %v2010_v19  ;;  %v1082_v53 = vmul.f32 %v2026_v47, %v2026_v47 }
 0x131   :  { %v1006_v27 = vadd.f32 %v1005_v25, %v2008_v14  ;;  %v1139_v31 = vadd.f32 %v1138_v63, %v1076_v52  ;;  %v1081_v14 = vmul.f32 %v2020_v38, %v2020_v38  ;;  %v1086_v8 = vmul.f32 %v2038_v11, %v2038_v11  ;;  %s1830_s2 = smov [#allocation4]   ;;  %s1831_s18 = smov [#allocation6]  }
 0x132   :  { %v1090_v22 = vmul.f32 %v2050_v41, %v2050_v41  ;;  %s1193_s17 = sshll.u32 %s1830_s2, 4  ;;  %s1203_s19 = sshll.u32 %s1831_s18, 4  ;;  %s1194_s17 = int_to_ptr.vmem [resolvable:$true] %s1193_s17  ;;  %s1204_s19 = int_to_ptr.vmem [resolvable:$true] %s1203_s19 }
 0x133   :  { %v1140_v33 = vadd.f32 %v1139_v31, %v1077_v26  ;;  %v1007_v34 = vadd.f32 %v1006_v27, %v2014_v23  ;;  %s1779_s20 = scalar_lea.vmem %s1194_s17, 128  ;;  %p1784_p9 = scmp.lt.s32.totalorder %s1194_s17, %s1194_s17 }
 0x134   :  { %p1780_p8 = scmp.ne.s32.totalorder %s1194_s17, %s1779_s20  ;;  %p1785_p10 = scmp.lt.s32.totalorder %s1779_s20, %s1779_s20 }
 0x135   :  { %v1008_v42 = vadd.f32 %v2006_v12, %v1007_v34  ;;  %v1141_v44 = vadd.f32 %v1140_v33, %v1078_v37  ;;  %v1083_v12 = vmul.f32 %v2018_v36, %v2018_v36  ;;  %v1094_v33 = vmul.f32 %v2062_v10, %v2062_v10 }
 0x136   :  { %p1786_p11 = por %p1785_p10, %p1784_p9 }
 0x137   :  { %v1142_v45 = vadd.f32 %v1141_v44, %v1079_v39  ;;  %v1009_v48 = vadd.f32 %v2010_v19, %v1008_v42  ;;  %v1084_v19 = vmul.f32 %v2022_v43, %v2022_v43 }
 0x138   :  { %p1787_p12 = pnand %p1786_p11, %p1780_p8 }
 0x139   :  { %v1010_v49 = vadd.f32 %v1009_v48, %v2020_v38  ;;  %v1143_v50 = vadd.f32 %v1142_v45, %v1080_v59  ;;  %v1085_v38 = vmul.f32 %v2032_v2, %v2032_v2  ;;  %v1098_v48 = vmul.f32 %v2074_v46, %v2074_v46 }
 0x13b   :  { %v1144_v51 = vadd.f32 %v1143_v50, %v1081_v14  ;;  %v1011_v23 = vadd.f32 %v1010_v49, %v2026_v47 }
 0x13d   :  { %v1012_v55 = vadd.f32 %v2018_v36, %v1011_v23  ;;  %v1145_v56 = vadd.f32 %v1144_v51, %v1082_v53  ;;  %v1087_v36 = vmul.f32 %v2030_v0, %v2030_v0 }
 0x13f   :  { %v1146_v57 = vadd.f32 %v1145_v56, %v1083_v12  ;;  %v1013_v60 = vadd.f32 %v2022_v43, %v1012_v55  ;;  %v1088_v43 = vmul.f32 %v2034_v7, %v2034_v7  ;;  %v1102_v55 = vmul.f32 %v2089_v16, %v2089_v16 }
 0x141   :  { %v1014_v62 = vadd.f32 %v1013_v60, %v2032_v2  ;;  %v1147_v1 = vadd.f32 %v1146_v57, %v1084_v19  ;;  %v1089_v2 = vmul.f32 %v2044_v30, %v2044_v30 }
 0x143   :  { %v1148_v3 = vadd.f32 %v1147_v1, %v1085_v38  ;;  %v1015_v47 = vadd.f32 %v1014_v62, %v2038_v11 }
 0x145   :  { %v1016_v9 = vadd.f32 %v2030_v0, %v1015_v47  ;;  %v1149_v15 = vadd.f32 %v1148_v3, %v1086_v8  ;;  %v1091_v0 = vmul.f32 %v2042_v28, %v2042_v28 }
 0x147   :  { %v1150_v17 = vadd.f32 %v1149_v15, %v1087_v36  ;;  %v1017_v18 = vadd.f32 %v2034_v7, %v1016_v9  ;;  %v1092_v7 = vmul.f32 %v2046_v35, %v2046_v35 }
 0x149   :  { %v1018_v20 = vadd.f32 %v1017_v18, %v2044_v30  ;;  %v1151_v21 = vadd.f32 %v1150_v17, %v1088_v43  ;;  %v1093_v30 = vmul.f32 %v2056_v61, %v2056_v61 }
 0x14b   :  { %v1152_v54 = vadd.f32 %v1151_v21, %v1089_v2  ;;  %v1019_v11 = vadd.f32 %v1018_v20, %v2050_v41 }
 0x14d   :  { %v1020_v24 = vadd.f32 %v2042_v28, %v1019_v11  ;;  %v1153_v52 = vadd.f32 %v1152_v54, %v1090_v22  ;;  %v1095_v28 = vmul.f32 %v2054_v58, %v2054_v58 }
 0x14f   :  { %v1154_v63 = vadd.f32 %v1153_v52, %v1091_v0  ;;  %v1021_v25 = vadd.f32 %v2046_v35, %v1020_v24  ;;  %v1096_v35 = vmul.f32 %v2058_v5, %v2058_v5 }
 0x151   :  { %v1022_v26 = vadd.f32 %v1021_v25, %v2056_v61  ;;  %v1155_v27 = vadd.f32 %v1154_v63, %v1092_v7  ;;  %v1097_v61 = vmul.f32 %v2068_v32, %v2068_v32 }
 0x153   :  { %v1156_v31 = vadd.f32 %v1155_v27, %v1093_v30  ;;  %v1023_v41 = vadd.f32 %v1022_v26, %v2062_v10 }
 0x155   :  { %v1024_v34 = vadd.f32 %v2054_v58, %v1023_v41  ;;  %v1157_v37 = vadd.f32 %v1156_v31, %v1094_v33  ;;  %v1099_v58 = vmul.f32 %v2066_v29, %v2066_v29 }
 0x157   :  { %v1158_v39 = vadd.f32 %v1157_v37, %v1095_v28  ;;  %v1025_v42 = vadd.f32 %v2058_v5, %v1024_v34  ;;  %v1100_v5 = vmul.f32 %v2070_v40, %v2070_v40 }
 0x159   :  { %v1026_v44 = vadd.f32 %v1025_v42, %v2068_v32  ;;  %v1159_v59 = vadd.f32 %v1158_v39, %v1096_v35  ;;  %v1101_v32 = vmul.f32 %v2082_v6, %v2082_v6 }
 0x15b   :  { %v1160_v45 = vadd.f32 %v1159_v59, %v1097_v61  ;;  %v1027_v10 = vadd.f32 %v1026_v44, %v2074_v46 }
 0x15d   :  { %v1028_v14 = vadd.f32 %v2066_v29, %v1027_v10  ;;  %v1161_v49 = vadd.f32 %v1160_v45, %v1098_v48  ;;  %v1103_v29 = vmul.f32 %v2080_v4, %v2080_v4 }
 0x15f   :  { %v1162_v50 = vadd.f32 %v1161_v49, %v1099_v58  ;;  %v1029_v51 = vadd.f32 %v2070_v40, %v1028_v14  ;;  %v1104_v40 = vmul.f32 %v2085_v13, %v2085_v13 }
 0x161   :  { %v1030_v23 = vadd.f32 %v1029_v51, %v2082_v6  ;;  %v1163_v53 = vadd.f32 %v1162_v50, %v1100_v5 }
 0x163   :  { %v1164_v12 = vadd.f32 %v1163_v53, %v1101_v32  ;;  %v1031_v46 = vadd.f32 %v1030_v23, %v2089_v16 }
 0x165   :  { %v1032_v56 = vadd.f32 %v2080_v4, %v1031_v46  ;;  %v1165_v19 = vadd.f32 %v1164_v12, %v1102_v55 }
 0x167   :  { %v1033_v57 = vadd.f32 %v2085_v13, %v1032_v56  ;;  %v1166_v60 = vadd.f32 %v1165_v19, %v1103_v29 }
 0x169   :  { %v1034_v6 = vrot.slane %v1033_v57, 4  ;;  %v1167_v38 = vadd.f32 %v1166_v60, %v1104_v40 }
 0x16b   :  { %v1035_v62 = vadd.f32 %v1034_v6, %v1033_v57  ;;  %v1168_v1 = vrot.slane %v1167_v38, 4 }
 0x16d   :  { %v1036_v3 = vrot.slane %v1035_v62, 2  ;;  %v1169_v47 = vadd.f32 %v1168_v1, %v1167_v38 }
 0x16f   :  { %v1037_v8 = vadd.f32 %v1036_v3, %v1035_v62  ;;  %v1170_v16 = vrot.slane %v1169_v47, 2 }
 0x171   :  { %v1038_v36 = vrot.slane %v1037_v8, 1  ;;  %v1171_v9 = vadd.f32 %v1170_v16, %v1169_v47 }
 0x173   :  { %v1039_v4 = vadd.f32 %v1038_v36, %v1037_v8  ;;  %v1172_v15 = vrot.slane %v1171_v9, 1 }
 0x175   :  { %1040 = vst [vmem:[#allocation4] sm:$0xff] %v1039_v4  ;;  %v1173_v13 = vadd.f32 %v1172_v15, %v1171_v9 }
 0x176   :  { %1790 = shalt.err (!%p1787_p12)
}
 0x177   :  { %s1791_s23 = scalar_lea.hbm %s2225_s3, 128 }
 0x178   :  { %p1792_p13 = scmp.ne.s32.totalorder %s2225_s3, %s1791_s23  ;;  %p1795_p0 = scmp.lt.u32.totalorder %s1791_s23, %s2225_s3 }
 0x17a   :  { %p1797_p1 = pnand %p1795_p0, %p1792_p13 }
 0x17c   :  { %1800 = shalt.err (!%p1797_p1)
}
 0x17d   :  { %1196 = dma.vmem_to_hbm [thread:$0]  %s1194_s17, 128, %s2225_s3, [#allocation5]   ;;  %1174 = vst [vmem:[#allocation6] sm:$0xff] %v1173_v13 }
 0x17e   :  { %s1801_s29 = scalar_lea.vmem %s1204_s19, 128  ;;  %p1806_p3 = scmp.lt.s32.totalorder %s1204_s19, %s1204_s19 }
 0x17f   :  { %p1802_p2 = scmp.ne.s32.totalorder %s1204_s19, %s1801_s29  ;;  %p1807_p4 = scmp.lt.s32.totalorder %s1801_s29, %s1801_s29 }
 0x181   :  { %p1808_p5 = por %p1807_p4, %p1806_p3 }
 0x183   :  { %p1809_p6 = pnand %p1808_p5, %p1802_p2 }
 0x185   :  { %1812 = shalt.err (!%p1809_p6)
}
 0x186   :  { %s1813_s5 = scalar_lea.hbm %s2226_s4, 128 }
 0x187   :  { %p1814_p7 = scmp.ne.s32.totalorder %s2226_s4, %s1813_s5  ;;  %p1817_p8 = scmp.lt.u32.totalorder %s1813_s5, %s2226_s4 }
 0x189   :  { %p1819_p9 = pnand %p1817_p8, %p1814_p7 }
 0x18b   :  { %1822 = shalt.err (!%p1819_p9)
}
 0x18c   :  { %1206 = dma.vmem_to_hbm [thread:$0]  %s1204_s19, 128, %s2226_s4, [#allocation5]  }
 0x18d   :  { %1823 = dma.done.wait [#allocation3], 4096  }
 0x18e   :  { %1824 = vsyncadd [#allocation3], 4294963200 }
 0x18f   :  { %1825 = dma.done.wait [#allocation5], 256  }
 0x190   :  { %1826 = vsyncadd [#allocation5], 4294967040 }
 0x191   :  { %1216 = vsyncpa [#allocation3], 1 }
 0x192   :  { %1217 = vsyncpa [#allocation5], 1 }

</bundles_post_ra>
